<compile_context>
chip_gen: v7x
topology: tpu7x:2x2x1
jax: 0.10.0
libtpu: 0.0.40
codegen_flags: <defaults>
</compile_context>

<pallas_src>
import jax
import jax.numpy as jnp
from jax import lax
from jax.experimental import pallas as pl
from jax.experimental.pallas import tpu as pltpu


def _rope_kernel(x_ref, cos_ref, sin_ref, o_ref):
    # x_ref / o_ref: (B, TS, H*D) interleaved channels, heads folded into lanes.
    # cos_ref / sin_ref: (TS, D) float32; sin carries the interleaved [-s, +s]
    # sign pattern, cos is pair-duplicated [c, c, ...].
    x = x_ref[...].astype(jnp.float32)
    _, _, HD = x.shape
    D = cos_ref.shape[-1]
    H = HD // D

    # On-chip head broadcast of the (TS, D) tables to the lane-dense (TS, HD)
    # layout (VMEM-local concat; HBM table traffic stays H x smaller).
    cos = jnp.concatenate([cos_ref[...]] * H, axis=-1)[None]   # (1, TS, HD)
    sin = jnp.concatenate([sin_ref[...]] * H, axis=-1)[None]   # (1, TS, HD)

    # Pairwise even/odd lane swap:
    #   swapped[..., 2k] = x[..., 2k+1] ; swapped[..., 2k+1] = x[..., 2k]
    # (roll wrap-around elements land on the unselected parity).
    left = jnp.roll(x, -1, axis=-1)      # left[..., i]  = x[..., i+1]
    right = jnp.roll(x, 1, axis=-1)      # right[..., i] = x[..., i-1]
    lane = lax.broadcasted_iota(jnp.int32, (1, 1, HD), 2)   # vreg-sized, hoisted
    swapped = jnp.where((lane & 1) == 0, left, right)

    # out[2k]   = x[2k]*c_k   - x[2k+1]*s_k
    # out[2k+1] = x[2k+1]*c_k + x[2k]*s_k
    o_ref[...] = (x * cos + swapped * sin).astype(o_ref.dtype)


def _vmem_capacity_bytes():
    try:
        return int(pltpu.get_tpu_info().vmem_capacity_bytes)
    except Exception:
        return 64 << 20            # conservative default (v7x per-core VMEM)


def _choose_seq_tile(B, S_pad, HD, itemsize, sublane):
    """Largest multiple-of-`sublane` divisor of S_pad fitting the VMEM budget."""
    row_bytes = max(1, B * HD * itemsize)   # one seq row of the x block
    row_f32 = B * HD * 4                    # f32 temporaries in the body
    vmem_cap = _vmem_capacity_bytes()
    # Per-step VMEM per seq row: double-buffered in + out (4x) plus ~7
    # full-tile f32 temporaries (x, left, right, swapped, out, cos, sin).
    per_row = 4 * row_bytes + 7 * row_f32
    usable = int(vmem_cap * 0.45)           # leave > half as headroom
    cap = usable // per_row
    cap = min(cap, (8 << 20) // row_bytes)  # >8 MiB blocks: diminishing returns
    if S_pad // 8 >= sublane:               # keep >=8 steps so both v7x TCs work
        cap = min(cap, S_pad // 8)
    cap = max(sublane, min(cap, S_pad))
    best = sublane
    t = sublane
    while t <= cap:
        if S_pad % t == 0:
            best = t
        t += sublane
    return best


def rotary_positional_encoding(x, d_model=None, *, seq_tile=None):
    """x: (B, S, H, D). Returns RoPE-rotated x with the same shape & dtype."""
    B, S, H, D = x.shape
    if d_model is None:
        d_model = D
    # The PyTorch module's broadcast is only well-formed when the trailing
    # head dim equals d_model, so that is the supported case here as well.
    assert d_model == D, "forward semantics require x.shape[-1] == d_model"
    assert D % 2 == 0, "d_model must be even for RoPE"
    HD = H * D
    itemsize = jnp.dtype(x.dtype).itemsize
    sublane = max(8, 32 // itemsize)        # 8 f32 / 16 bf16 / 32 int8

    # Pad the sequence up to the sublane multiple (no silent full-S block).
    S_pad = ((S + sublane - 1) // sublane) * sublane

    # --- precompute (S_pad, D) sin/cos tables: tiny, read once per row -------
    inv_freq = 1.0 / (10000.0 ** (jnp.arange(0, D, 2, dtype=jnp.float32) / D))
    freqs = jnp.outer(jnp.arange(S_pad, dtype=jnp.float32), inv_freq)  # (S_pad, D//2)
    cos = jnp.cos(freqs)
    sin = jnp.sin(freqs)
    # Interleave to width D: cos -> [c0,c0,c1,c1,...], sin -> [-s0,+s0,-s1,+s1,...]
    cos_il = jnp.repeat(cos, 2, axis=-1)                         # (S_pad, D)
    sin_il = jnp.stack([-sin, sin], axis=-1).reshape(S_pad, D)   # (S_pad, D)

    # Free (contiguous) reshape: fold heads into the lane dimension.
    x_flat = x.reshape(B, S, HD)
    if S_pad != S:
        x_flat = jnp.pad(x_flat, ((0, 0), (0, S_pad - S), (0, 0)))

    if seq_tile is None:
        seq_tile = _choose_seq_tile(B, S_pad, HD, itemsize, sublane)
    assert S_pad % seq_tile == 0 and seq_tile % sublane == 0
    grid = (S_pad // seq_tile,)

    data_spec = pl.BlockSpec((B, seq_tile, HD), lambda i: (0, i, 0))
    tbl_spec = pl.BlockSpec((seq_tile, D), lambda i: (i, 0))

    # Scoped-VMEM budget: double-buffered blocks + in-kernel f32 temporaries.
    xb = B * seq_tile * HD * itemsize
    xb_f32 = B * seq_tile * HD * 4
    tb = seq_tile * D * 4
    est = 4 * xb + 4 * tb + 7 * xb_f32 + (4 << 20)
    vmem_limit = int(max(32 << 20, min(est, _vmem_capacity_bytes())))

    out_flat = pl.pallas_call(
        _rope_kernel,
        grid_spec=pltpu.PrefetchScalarGridSpec(
            num_scalar_prefetch=0,
            grid=grid,
            in_specs=[data_spec, tbl_spec, tbl_spec],
            out_specs=data_spec,
        ),
        out_shape=jax.ShapeDtypeStruct((B, S_pad, HD), x.dtype),
        compiler_params=pltpu.CompilerParams(
            dimension_semantics=("parallel",),
            vmem_limit_bytes=vmem_limit),
    )(x_flat, cos_il, sin_il)

    if S_pad != S:
        out_flat = out_flat[:, :S, :]
    # Free reshape back to the original layout.
    return out_flat.reshape(B, S, H, D)


def _reference(x, d_model):
    B, S, H, D = x.shape
    inv_freq = 1.0 / (10000.0 ** (jnp.arange(0, d_model, 2, dtype=jnp.float32)
                                  / d_model))
    freqs = jnp.outer(jnp.arange(S, dtype=jnp.float32), inv_freq)   # (S, D//2)
    sin = jnp.sin(freqs)[:, None, :]
    cos = jnp.cos(freqs)[:, None, :]
    x1, x2 = x[..., ::2], x[..., 1::2]
    x_rot = jnp.stack([x1 * cos - x2 * sin, x1 * sin + x2 * cos], axis=-1)
    return x_rot.reshape(B, S, H, D)


if __name__ == "__main__":
    B, S, H, D = 2, 8, 4, 32   # batch, seq, heads, d_model
    key = jax.random.PRNGKey(0)
    x = jax.random.normal(key, (B, S, H, D), dtype=jnp.float32)

    out = rotary_positional_encoding(x, d_model=D)
    out = jax.block_until_ready(out)

    ref = _reference(x, D)
    assert out.shape == x.shape and out.dtype == x.dtype
    assert jnp.allclose(out, ref, atol=1e-5, rtol=1e-5), "mismatch vs reference"
    print("KERNEL_OK")
</pallas_src>

<mosaic_0001>
module attributes {stable_mosaic.version = 11 : i64} {
  func.func @_rope_kernel(%arg0: i32, %arg1: memref<2x8x128xf32, #tpu.memory_space<vmem>>, %arg2: memref<8x32xf32, #tpu.memory_space<vmem>>, %arg3: memref<8x32xf32, #tpu.memory_space<vmem>>, %arg4: memref<2x8x128xf32, #tpu.memory_space<vmem>>) attributes {dimension_semantics = [#tpu.dimension_semantics<parallel>], iteration_bounds = array<i64: 1>, scalar_prefetch = 0 : i64, scratch_operands = 0 : i64, tpu.core_type = #tpu.core_type<tc>, window_params = [{transform_indices = @transform_0, window_bounds = array<i64: 2, 8, 128>}, {transform_indices = @transform_1, window_bounds = array<i64: 8, 32>}, {transform_indices = @transform_2, window_bounds = array<i64: 8, 32>}, {transform_indices = @transform_3, window_bounds = array<i64: 2, 8, 128>}]} {
    %c0 = arith.constant 0 : index
    %c0_0 = arith.constant 0 : index
    %c0_1 = arith.constant 0 : index
    %0 = vector.load %arg1[%c0, %c0_0, %c0_1] : memref<2x8x128xf32, #tpu.memory_space<vmem>>, vector<2x8x128xf32>
    %c0_2 = arith.constant 0 : index
    %c0_3 = arith.constant 0 : index
    %1 = vector.load %arg2[%c0_2, %c0_3] : memref<8x32xf32, #tpu.memory_space<vmem>>, vector<8x32xf32>
    %2 = tpu.concatenate %1, %1, %1, %1 in 1 : vector<8x32xf32>, vector<8x32xf32>, vector<8x32xf32>, vector<8x32xf32> -> vector<8x128xf32>
    %3 = vector.shape_cast %2 : vector<8x128xf32> to vector<1x8x128xf32>
    %c0_4 = arith.constant 0 : index
    %c0_5 = arith.constant 0 : index
    %4 = vector.load %arg3[%c0_4, %c0_5] : memref<8x32xf32, #tpu.memory_space<vmem>>, vector<8x32xf32>
    %5 = tpu.concatenate %4, %4, %4, %4 in 1 : vector<8x32xf32>, vector<8x32xf32>, vector<8x32xf32>, vector<8x32xf32> -> vector<8x128xf32>
    %6 = vector.shape_cast %5 : vector<8x128xf32> to vector<1x8x128xf32>
    %7 = vector.extract_strided_slice %0 {offsets = [0, 0, 1], sizes = [2, 8, 127], strides = [1, 1, 1]} : vector<2x8x128xf32> to vector<2x8x127xf32>
    %8 = vector.extract_strided_slice %0 {offsets = [0, 0, 0], sizes = [2, 8, 1], strides = [1, 1, 1]} : vector<2x8x128xf32> to vector<2x8x1xf32>
    %9 = tpu.concatenate %7, %8 in 2 : vector<2x8x127xf32>, vector<2x8x1xf32> -> vector<2x8x128xf32>
    %10 = vector.extract_strided_slice %0 {offsets = [0, 0, 127], sizes = [2, 8, 1], strides = [1, 1, 1]} : vector<2x8x128xf32> to vector<2x8x1xf32>
    %11 = vector.extract_strided_slice %0 {offsets = [0, 0, 0], sizes = [2, 8, 127], strides = [1, 1, 1]} : vector<2x8x128xf32> to vector<2x8x127xf32>
    %12 = tpu.concatenate %10, %11 in 2 : vector<2x8x1xf32>, vector<2x8x127xf32> -> vector<2x8x128xf32>
    %13 = tpu.iota {dimensions = array<i32: 2>} : vector<1x1x128xi32>
    %c1_i32 = arith.constant 1 : i32
    %14 = vector.broadcast %c1_i32 : i32 to vector<1x1x128xi32>
    %15 = arith.andi %13, %14 : vector<1x1x128xi32>
    %c0_i32 = arith.constant 0 : i32
    %16 = vector.broadcast %c0_i32 : i32 to vector<1x1x128xi32>
    %17 = arith.cmpi eq, %15, %16 : vector<1x1x128xi32>
    %18 = vector.shape_cast %17 : vector<1x1x128xi1> to vector<1x1x128xi1>
    %19 = vector.broadcast %18 : vector<1x1x128xi1> to vector<2x8x128xi1>
    %20 = arith.select %19, %9, %12 : vector<2x8x128xi1>, vector<2x8x128xf32>
    %21 = vector.broadcast %3 : vector<1x8x128xf32> to vector<2x8x128xf32>
    %22 = arith.mulf %0, %21 : vector<2x8x128xf32>
    %23 = vector.broadcast %6 : vector<1x8x128xf32> to vector<2x8x128xf32>
    %24 = arith.mulf %20, %23 : vector<2x8x128xf32>
    %25 = arith.addf %22, %24 : vector<2x8x128xf32>
    %c0_6 = arith.constant 0 : index
    %c0_7 = arith.constant 0 : index
    %c0_8 = arith.constant 0 : index
    %26 = vector.load %arg4[%c0_6, %c0_7, %c0_8] : memref<2x8x128xf32, #tpu.memory_space<vmem>>, vector<2x8x128xf32>
    tpu.vector_store %arg4[%c0_6, %c0_7, %c0_8], %25 {strides = array<i32>} : memref<2x8x128xf32, #tpu.memory_space<vmem>>, vector<2x8x128xf32>,
    return
  }
  func.func @transform_0(%arg0: i32) -> (i32, i32, i32) {
    %c0_i32 = arith.constant 0 : i32
    %c0_i32_0 = arith.constant 0 : i32
    %c0_i32_1 = arith.constant 0 : i32
    return %c0_i32, %arg0, %c0_i32_0 : i32, i32, i32
  }
  func.func @transform_1(%arg0: i32) -> (i32, i32) {
    %c0_i32 = arith.constant 0 : i32
    %c0_i32_0 = arith.constant 0 : i32
    return %arg0, %c0_i32 : i32, i32
  }
  func.func @transform_2(%arg0: i32) -> (i32, i32) {
    %c0_i32 = arith.constant 0 : i32
    %c0_i32_0 = arith.constant 0 : i32
    return %arg0, %c0_i32 : i32, i32
  }
  func.func @transform_3(%arg0: i32) -> (i32, i32, i32) {
    %c0_i32 = arith.constant 0 : i32
    %c0_i32_0 = arith.constant 0 : i32
    %c0_i32_1 = arith.constant 0 : i32
    return %c0_i32, %arg0, %c0_i32_0 : i32, i32, i32
  }
}

</mosaic_0001>

<bundles_post_ra>
// kernel: tpu_custom_call.1
= control target key start
LH: loop header
LB: loop body
LE: loop exit
PB: predicated region body
PF: predicated region fallthrough
CT: control target
= control target key end

     0   :  { %8 = vsyncpa [#allocation3], 0  ;;  %s330_s0 = inlined_call_operand.hbm [shape: f32[2,8,128], index: 0, kind: input, shape index: {}]   ;;  %s331_s1 = inlined_call_operand.hbm [shape: f32[8,32], index: 1, kind: input, shape index: {}]   ;;  %s332_s2 = inlined_call_operand.hbm [shape: f32[8,32], index: 2, kind: input, shape index: {}]   ;;  %s333_s3 = inlined_call_operand.hbm [shape: f32[2,8,128], index: 3, kind: output, shape index: {}]  }
   0x1   :  { %9 = vsyncpa [#allocation6], 0 }
   0x2   :  { %10 = vsyncpa [#allocation4], 0  ;;  %s238_s12 = smov [#allocation5]   ;;  %s239_s14 = smov [#allocation2]  }
   0x3   :  { %s29_s13 = sshll.u32 %s238_s12, 4  ;;  %s16_s15 = sshll.u32 %s239_s14, 4  ;;  %s30_s13 = int_to_ptr.vmem [resolvable:$true] %s29_s13  ;;  %s269_s15 = int_to_ptr.vmem [resolvable:$true] %s16_s15 }
   0x4   :  { %s144_s18 = scalar_lea.hbm %s331_s1, 128 }
   0x5   :  { %p145_p0 = scmp.ne.s32.totalorder %s331_s1, %s144_s18  ;;  %p148_p1 = scmp.lt.u32.totalorder %s144_s18, %s331_s1 }
   0x7   :  { %p150_p2 = pnand %p148_p1, %p145_p0 }
   0x9   :  { %153 = shalt.err (!%p150_p2)
}
   0xa   :  { %s154_s23 = scalar_lea.vmem %s30_s13, 128  ;;  %p159_p4 = scmp.lt.s32.totalorder %s30_s13, %s30_s13 }
   0xb   :  { %p155_p3 = scmp.ne.s32.totalorder %s30_s13, %s154_s23  ;;  %p160_p5 = scmp.lt.s32.totalorder %s154_s23, %s154_s23 }
   0xd   :  { %p161_p6 = por %p160_p5, %p159_p4 }
   0xf   :  { %p162_p7 = pnand %p161_p6, %p155_p3 }
  0x11   :  { %165 = shalt.err (!%p162_p7)
}
  0x12   :  { %32 = dma.hbm_to_vmem [thread:$0]  %s331_s1, 128, %s30_s13, [#allocation6]  }
  0x13   :  { %s166_s28 = scalar_lea.hbm %s330_s0, 256 }
  0x14   :  { %p167_p8 = scmp.ne.s32.totalorder %s330_s0, %s166_s28  ;;  %p170_p9 = scmp.lt.u32.totalorder %s166_s28, %s330_s0 }
  0x16   :  { %p172_p10 = pnand %p170_p9, %p167_p8 }
  0x18   :  { %175 = shalt.err (!%p172_p10)
}
  0x19   :  { %s176_s6 = scalar_lea.vmem %s269_s15, 256  ;;  %p181_p12 = scmp.lt.s32.totalorder %s269_s15, %s269_s15 }
  0x1a   :  { %p177_p11 = scmp.ne.s32.totalorder %s269_s15, %s176_s6  ;;  %p182_p13 = scmp.lt.s32.totalorder %s176_s6, %s176_s6 }
  0x1c   :  { %p183_p0 = por %p182_p13, %p181_p12 }
  0x1e   :  { %p184_p1 = pnand %p183_p0, %p177_p11 }
  0x20   :  { %187 = shalt.err (!%p184_p1)
}
  0x21   :  { %s240_s1 = smov 128   ;;  %s241_s7 = smov 8  }
  0x22   :  { %22 = dma.hbm_to_vmem [thread:$0]  %s330_s0, 256, %s269_s15, [#allocation3], %s240_s1, %s240_s1, %s241_s7  }
  0x23   :  { %s242_s10 = smov [#allocation7]   ;;  %s188_s14 = scalar_lea.hbm %s332_s2, 128 }
  0x24   :  { %s39_s11 = sshll.u32 %s242_s10, 4  ;;  %p189_p2 = scmp.ne.s32.totalorder %s332_s2, %s188_s14  ;;  %s40_s11 = int_to_ptr.vmem [resolvable:$true] %s39_s11 }
  0x25   :  { %p192_p3 = scmp.lt.u32.totalorder %s188_s14, %s332_s2 }
  0x27   :  { %p194_p4 = pnand %p192_p3, %p189_p2 }
  0x29   :  { %197 = shalt.err (!%p194_p4)
}
  0x2a   :  { %s198_s20 = scalar_lea.vmem %s40_s11, 128  ;;  %p203_p6 = scmp.lt.s32.totalorder %s40_s11, %s40_s11 }
  0x2b   :  { %p199_p5 = scmp.ne.s32.totalorder %s40_s11, %s198_s20  ;;  %p204_p7 = scmp.lt.s32.totalorder %s198_s20, %s198_s20 }
  0x2d   :  { %p205_p8 = por %p204_p7, %p203_p6 }
  0x2f   :  { %p206_p9 = pnand %p205_p8, %p199_p5 }
  0x31   :  { %209 = shalt.err (!%p206_p9)
}
  0x32   :  { %42 = dma.hbm_to_vmem [thread:$0]  %s332_s2, 128, %s40_s11, [#allocation6]  }
  0x33   :  { %232 = dma.done.wait [#allocation3], 256  }
  0x34   :  { %233 = vsyncadd [#allocation3], 4294967040 }
  0x35   :  { %234 = dma.done.wait [#allocation6], 256  }
  0x36   :  { %235 = vsyncadd [#allocation6], 4294967040  ;;  %v54_v0 = vld [vmem:[#allocation5] sm:$0xff]  ;;  %s243_s21 = smov 64   ;;  %s244_s22 = smov 32   ;;  %v71_v1 = vld [vmem:[#allocation7] sm:$0xff]  ;;  %v99_v6 = vlaneseq }
  0x37   :  { %59 = vrot.lane.b32.xlu1 %v54_v0, %s243_s21  ;;  %56 = vrot.lane.b32.xlu0 %v54_v0, %s244_s22  ;;  %s245_s23 = smov 96   ;;  %v53_v2 = vld [vmem:[#allocation2 + $0x8] sm:$0xff]  ;;  %v52_v3 = vld [vmem:[#allocation2] sm:$0xff]  ;;  %s246_s24 = smov 127   ;;  %vm65_vm0 = vcmask 261120   ;;  %vm67_vm1 = vcmask 523264  }
  0x38   :  { %s247_s2 = smov 1   ;;  %v100_v9 = vand.u32 127, %v99_v6  ;;  %vm69_vm2 = vcmask 785408   ;;  %s248_s25 = smov [#allocation8]  }
  0x39   :  { %s120_s26 = sshll.u32 %s248_s25, 4  ;;  %s121_s26 = int_to_ptr.vmem [resolvable:$true] %s120_s26 }
  0x3a   :  { %v101_v12 = vand.u32 1, %v100_v9  ;;  %s210_s27 = scalar_lea.vmem %s121_s26, 256  ;;  %p215_p11 = scmp.lt.s32.totalorder %s121_s26, %s121_s26 }
  0x3b   :  { %76 = vrot.lane.b32.xlu1 %v71_v1, %s243_s21  ;;  %73 = vrot.lane.b32.xlu0 %v71_v1, %s244_s22  ;;  %p211_p10 = scmp.ne.s32.totalorder %s121_s26, %s210_s27  ;;  %p216_p12 = scmp.lt.s32.totalorder %s210_s27, %s210_s27 }
  0x3c   :  { %vm102_vm3 = vcmp.eq.s32.totalorder %v101_v12, 0 }
  0x3d   :  { %p217_p13 = por %p216_p12, %p215_p11 }
  0x3f   :  { %79 = vrot.lane.b32.xlu1 %v71_v1, %s245_s23  ;;  %62 = vrot.lane.b32.xlu0 %v54_v0, %s245_s23  ;;  %p218_p0 = pnand %p217_p13, %p211_p10 }
  0x43   :  { %89 = vrot.lane.b32.xlu1 %v53_v2, %s246_s24  ;;  %87 = vrot.lane.b32.xlu0 %v52_v3, %s246_s24 }
  0x47   :  { %95 = vrot.lane.b32.xlu1 %v53_v2, %s247_s2  ;;  %93 = vrot.lane.b32.xlu0 %v52_v3, %s247_s2 }
  0xa9   :  { %v60_v4 = vpop.permute.xlu1 %59  ;;  %v57_v5 = vpop.permute.xlu0 %56 }
  0xaa   :  { %v66_v13 = vsel %vm65_vm0, %v54_v0, %v57_v5 }
  0xab   :  { %v68_v17 = vsel %vm67_vm1, %v66_v13, %v60_v4 }
  0xad   :  { %v77_v7 = vpop.permute.xlu1 %76  ;;  %v74_v8 = vpop.permute.xlu0 %73 }
  0xae   :  { %v82_v16 = vsel %vm65_vm0, %v71_v1, %v74_v8 }
  0xaf   :  { %v83_v19 = vsel %vm67_vm1, %v82_v16, %v77_v7 }
  0xb1   :  { %v80_v10 = vpop.permute.xlu1 %79  ;;  %v63_v11 = vpop.permute.xlu0 %62 }
  0xb2   :  { %v70_v18 = vsel %vm69_vm2, %v68_v17, %v63_v11  ;;  %v84_v22 = vsel %vm69_vm2, %v83_v19, %v80_v10 }
  0xb3   :  { %v107_v25 = vmul.f32 %v70_v18, %v52_v3  ;;  %v108_v26 = vmul.f32 %v70_v18, %v53_v2 }
  0xb5   :  { %v90_v14 = vpop.permute.xlu1 %89  ;;  %v88_v15 = vpop.permute.xlu0 %87 }
  0xb9   :  { %v96_v20 = vpop.permute.xlu1 %95  ;;  %v94_v21 = vpop.permute.xlu0 %93 }
  0xba   :  { %v106_v23 = vsel %vm102_vm3, %v90_v14, %v96_v20  ;;  %v105_v24 = vsel %vm102_vm3, %v88_v15, %v94_v21 }
  0xbb   :  { %v110_v27 = vmul.f32 %v106_v23, %v84_v22  ;;  %v109_v28 = vmul.f32 %v105_v24, %v84_v22 }
  0xbd   :  { %v112_v29 = vadd.f32 %v110_v27, %v108_v26  ;;  %v111_v30 = vadd.f32 %v109_v28, %v107_v25 }
  0xbf   :  { %114 = vst [vmem:[#allocation8 + $0x8] sm:$0xff] %v112_v29  ;;  %113 = vst [vmem:[#allocation8] sm:$0xff] %v111_v30 }
  0xc0   :  { %221 = shalt.err (!%p218_p0)
}
  0xc1   :  { %s222_s30 = scalar_lea.hbm %s333_s3, 256 }
  0xc2   :  { %p223_p1 = scmp.ne.s32.totalorder %s333_s3, %s222_s30  ;;  %p226_p2 = scmp.lt.u32.totalorder %s222_s30, %s333_s3 }
  0xc4   :  { %p228_p3 = pnand %p226_p2, %p223_p1 }
  0xc6   :  { %231 = shalt.err (!%p228_p3)
}
  0xc7   :  { %126 = dma.vmem_to_hbm [thread:$0]  %s121_s26, 256, %s333_s3, [#allocation4], %s240_s1, %s240_s1, %s241_s7  }
  0xc8   :  { %236 = dma.done.wait [#allocation4], 256  }
  0xc9   :  { %237 = vsyncadd [#allocation4], 4294967040 }
  0xca   :  { %130 = vsyncpa [#allocation3], 1 }
  0xcb   :  { %131 = vsyncpa [#allocation6], 1 }
  0xcc   :  { %132 = vsyncpa [#allocation4], 1 }

</bundles_post_ra>
